<compile_context>
chip_gen: v7x
topology: tpu7x:2x2x1
jax: 0.10.0
libtpu: 0.0.40
codegen_flags: <defaults>
</compile_context>

<pallas_src>
import functools

import jax
import jax.numpy as jnp
import numpy as np
from jax import lax
from jax.experimental import pallas as pl
from jax.experimental.pallas import tpu as pltpu


def _round_up(x, m):
    return ((x + m - 1) // m) * m


# ----------------------------------------------------------------------------
# Kernel 1: hoisted input projection  G_x = X @ W_ih^T + (b_ih + b_hh)
# ----------------------------------------------------------------------------
def _input_proj_kernel(x_ref, w_ref, b_ref, o_ref):
    o_ref[...] = (
        jnp.dot(x_ref[...], w_ref[...], preferred_element_type=jnp.float32)
        + b_ref[...]
    ).astype(o_ref.dtype)


def _input_projection(x2d, w_ih_t, bias):
    """x2d: [M, D]  ->  [M, 4H] = x2d @ w_ih_t + bias  (one big MXU matmul)."""
    M, D = x2d.shape
    G = w_ih_t.shape[1]
    m_blk = 256 if M >= 256 else _round_up(M, 8)
    m_pad = _round_up(M, m_blk)
    if m_pad != M:
        x2d = jnp.pad(x2d, ((0, m_pad - M), (0, 0)))
    out = pl.pallas_call(
        _input_proj_kernel,
        out_shape=jax.ShapeDtypeStruct((m_pad, G), jnp.float32),
        grid=(m_pad // m_blk,),
        in_specs=[
            pl.BlockSpec((m_blk, D), lambda i: (i, 0)),   # row tiles of X
            pl.BlockSpec((D, G), lambda i: (0, 0)),       # W_ih^T resident
            pl.BlockSpec((1, G), lambda i: (0, 0)),       # folded bias resident
        ],
        out_specs=pl.BlockSpec((m_blk, G), lambda i: (i, 0)),
        compiler_params=pltpu.CompilerParams(
            dimension_semantics=("parallel",)),
    )(x2d, w_ih_t, bias)
    return out[:M]


# ----------------------------------------------------------------------------
# Kernel 2: sequential LSTM recurrence over streamed T-blocks of G_x
# ----------------------------------------------------------------------------
def _lstm_recurrence_kernel(lens_ref, gx_ref, whh_ref, out_ref,
                            h_ref, c_ref, *, t_blk, hidden):
    tb = pl.program_id(0)

    @pl.when(tb == 0)
    def _():
        h_ref[...] = jnp.zeros_like(h_ref)
        c_ref[...] = jnp.zeros_like(c_ref)

    whh = whh_ref[...]        # [H, 4H]  resident in VMEM across the whole grid
    len_col = lens_ref[...]   # [B, 1] int32, resident

    def step(i, carry):
        t = tb * t_blk + i                              # global timestep
        # Only the unavoidable recurrent matmul is inside the time loop.
        gates = gx_ref[i].astype(jnp.float32) + jnp.dot(
            h_ref[...], whh, preferred_element_type=jnp.float32)   # [B, 4H]
        i_g = jax.nn.sigmoid(gates[:, 0 * hidden:1 * hidden])
        f_g = jax.nn.sigmoid(gates[:, 1 * hidden:2 * hidden])
        g_g = jnp.tanh(gates[:, 2 * hidden:3 * hidden])
        o_g = jax.nn.sigmoid(gates[:, 3 * hidden:4 * hidden])
        c_new = f_g * c_ref[...] + i_g * g_g
        h_new = o_g * jnp.tanh(c_new)

        valid = t < len_col                             # [B, 1] vectorized mask
        h_ref[...] = jnp.where(valid, h_new, h_ref[...])    # freeze state
        c_ref[...] = jnp.where(valid, c_new, c_ref[...])
        # lane-dense, time-major store; zero at padded positions
        out_ref[i] = jnp.where(valid, h_new, 0.0).astype(out_ref.dtype)
        return carry

    lax.fori_loop(0, t_blk, step, 0)


def _lstm_layer_recurrence(gx_tm, w_hh_t, lens_col, t_blk):
    """gx_tm: [T_pad, B, 4H] time-major gates -> [T_pad, B, H] hidden states."""
    t_pad, B, G = gx_tm.shape
    H = w_hh_t.shape[0]
    kernel = functools.partial(_lstm_recurrence_kernel, t_blk=t_blk, hidden=H)
    return pl.pallas_call(
        kernel,
        out_shape=jax.ShapeDtypeStruct((t_pad, B, H), jnp.float32),
        grid=(t_pad // t_blk,),
        in_specs=[
            pl.BlockSpec((B, 1), lambda t: (0, 0)),            # lens, resident
            pl.BlockSpec((t_blk, B, G), lambda t: (t, 0, 0)),  # G_x streamed
            pl.BlockSpec((H, G), lambda t: (0, 0)),            # W_hh^T resident
        ],
        out_specs=pl.BlockSpec((t_blk, B, H), lambda t: (t, 0, 0)),
        scratch_shapes=[
            pltpu.VMEM((B, H), jnp.float32),   # h state (persists across grid)
            pltpu.VMEM((B, H), jnp.float32),   # c state
        ],
        compiler_params=pltpu.CompilerParams(
            dimension_semantics=("arbitrary",)),   # sequential recurrence
    )(lens_col, gx_tm, w_hh_t)


# ----------------------------------------------------------------------------
# DyLSTMLayer forward (batch-first in/out, pad_packed_sequence semantics)
# ----------------------------------------------------------------------------
def dylstm_forward(x, lens, params, t_blk=64):
    """x: [B, T, D] batch-first.  lens: length-B int sequence (unsorted OK).
    params: list of (w_ih, w_hh, b_ih, b_hh) per layer in PyTorch layout
            (w_ih [4H, D_in], w_hh [4H, H], biases [4H]).
    Returns [B, max(lens), H] with zeros at padded positions."""
    B, T, _ = x.shape
    lens_np = np.asarray(lens, dtype=np.int32)
    t_max = int(lens_np.max())

    t_blk = min(t_blk, T)
    t_pad = _round_up(T, t_blk)

    # time-major, padded along T so the grid tiles evenly
    x_tm = jnp.transpose(x, (1, 0, 2))
    if t_pad != T:
        x_tm = jnp.pad(x_tm, ((0, t_pad - T), (0, 0), (0, 0)))

    lens_col = jnp.asarray(lens_np).reshape(B, 1)

    h_tm = x_tm
    for (w_ih, w_hh, b_ih, b_hh) in params:
        H = w_hh.shape[1]
        w_ih_t = jnp.transpose(w_ih)           # [D_in, 4H]
        w_hh_t = jnp.transpose(w_hh)           # [H, 4H]
        bias = (b_ih + b_hh).reshape(1, -1)    # bias folded into G_x once

        d_in = h_tm.shape[-1]
        gx2 = _input_projection(h_tm.reshape(t_pad * B, d_in), w_ih_t, bias)
        gx_tm = gx2.reshape(t_pad, B, 4 * H)
        h_tm = _lstm_layer_recurrence(gx_tm, w_hh_t, lens_col, t_blk)

    # [T, B, H] -> [B, max(lens), H]; padded positions already zero.
    return jnp.transpose(h_tm[:t_max], (1, 0, 2))


# ----------------------------------------------------------------------------
# Parameter init (PyTorch nn.LSTM style) and a pure-JAX reference
# ----------------------------------------------------------------------------
def init_lstm_params(key, in_dim, out_dim, n_layer):
    params = []
    k = 1.0 / np.sqrt(out_dim)
    for l in range(n_layer):
        d_in = in_dim if l == 0 else out_dim
        key, k1, k2, k3, k4 = jax.random.split(key, 5)
        w_ih = jax.random.uniform(k1, (4 * out_dim, d_in), jnp.float32, -k, k)
        w_hh = jax.random.uniform(k2, (4 * out_dim, out_dim), jnp.float32, -k, k)
        b_ih = jax.random.uniform(k3, (4 * out_dim,), jnp.float32, -k, k)
        b_hh = jax.random.uniform(k4, (4 * out_dim,), jnp.float32, -k, k)
        params.append((w_ih, w_hh, b_ih, b_hh))
    return params


def dylstm_reference(x, lens, params):
    B, T, _ = x.shape
    lens_np = np.asarray(lens, dtype=np.int32)
    t_max = int(lens_np.max())
    lens_j = jnp.asarray(lens_np)
    inp = x
    for (w_ih, w_hh, b_ih, b_hh) in params:
        H = w_hh.shape[1]
        h = jnp.zeros((B, H), jnp.float32)
        c = jnp.zeros((B, H), jnp.float32)
        outs = []
        for t in range(T):
            gates = inp[:, t, :] @ w_ih.T + h @ w_hh.T + b_ih + b_hh
            i_g = jax.nn.sigmoid(gates[:, :H])
            f_g = jax.nn.sigmoid(gates[:, H:2 * H])
            g_g = jnp.tanh(gates[:, 2 * H:3 * H])
            o_g = jax.nn.sigmoid(gates[:, 3 * H:])
            c_new = f_g * c + i_g * g_g
            h_new = o_g * jnp.tanh(c_new)
            valid = (t < lens_j)[:, None]
            h = jnp.where(valid, h_new, h)
            c = jnp.where(valid, c_new, c)
            outs.append(jnp.where(valid, h_new, 0.0))
        inp = jnp.stack(outs, axis=1)
    return inp[:, :t_max, :]


if __name__ == "__main__":
    key = jax.random.PRNGKey(0)
    B, T, D, H, L = 2, 8, 16, 32, 2
    key, kx = jax.random.split(key)
    x = jax.random.normal(kx, (B, T, D), jnp.float32)
    lens = [8, 5]                       # variable sequence lengths
    params = init_lstm_params(key, D, H, L)

    out = jax.block_until_ready(dylstm_forward(x, lens, params))
    ref = jax.block_until_ready(dylstm_reference(x, lens, params))

    assert out.shape == ref.shape, (out.shape, ref.shape)
    err = float(jnp.max(jnp.abs(out - ref)))
    assert err < 2e-3, f"max abs err {err}"
    print("KERNEL_OK")
</pallas_src>

<mosaic_0001>
module attributes {stable_mosaic.version = 11 : i64} {
  func.func @_input_proj_kernel(%arg0: i32, %arg1: memref<16x16xf32, #tpu.memory_space<vmem>>, %arg2: memref<16x128xf32, #tpu.memory_space<vmem>>, %arg3: memref<1x128xf32, #tpu.memory_space<vmem>>, %arg4: memref<16x128xf32, #tpu.memory_space<vmem>>) attributes {dimension_semantics = [#tpu.dimension_semantics<parallel>], iteration_bounds = array<i64: 1>, scalar_prefetch = 0 : i64, scratch_operands = 0 : i64, tpu.core_type = #tpu.core_type<tc>, window_params = [{transform_indices = @transform_0, window_bounds = array<i64: 16, 16>}, {pipeline_mode = #tpu.pipeline_mode<synchronous>, transform_indices = @transform_1, window_bounds = array<i64: 16, 128>}, {pipeline_mode = #tpu.pipeline_mode<synchronous>, transform_indices = @transform_2, window_bounds = array<i64: 1, 128>}, {transform_indices = @transform_3, window_bounds = array<i64: 16, 128>}]} {
    %c0 = arith.constant 0 : index
    %c0_0 = arith.constant 0 : index
    %0 = vector.load %arg1[%c0, %c0_0] : memref<16x16xf32, #tpu.memory_space<vmem>>, vector<16x16xf32>
    %c0_1 = arith.constant 0 : index
    %c0_2 = arith.constant 0 : index
    %1 = vector.load %arg2[%c0_1, %c0_2] : memref<16x128xf32, #tpu.memory_space<vmem>>, vector<16x128xf32>
    %cst = arith.constant dense<0.000000e+00> : vector<16x128xf32>
    %2 = tpu.matmul %0, %1, %cst {dimension_numbers = #tpu.dot_dimension_numbers<[1], [0], [0], [1], [0, 0, 1, 1], [], []>} : vector<16x16xf32>, vector<16x128xf32>, vector<16x128xf32> -> vector<16x128xf32>
    %c0_3 = arith.constant 0 : index
    %c0_4 = arith.constant 0 : index
    %3 = vector.load %arg3[%c0_3, %c0_4] : memref<1x128xf32, #tpu.memory_space<vmem>>, vector<1x128xf32>
    %4 = vector.broadcast %3 : vector<1x128xf32> to vector<16x128xf32>
    %5 = arith.addf %2, %4 : vector<16x128xf32>
    %c0_5 = arith.constant 0 : index
    %c0_6 = arith.constant 0 : index
    %6 = vector.load %arg4[%c0_5, %c0_6] : memref<16x128xf32, #tpu.memory_space<vmem>>, vector<16x128xf32>
    tpu.vector_store %arg4[%c0_5, %c0_6], %5 {strides = array<i32>} : memref<16x128xf32, #tpu.memory_space<vmem>>, vector<16x128xf32>,
    return
  }
  func.func @transform_0(%arg0: i32) -> (i32, i32) {
    %c0_i32 = arith.constant 0 : i32
    %c0_i32_0 = arith.constant 0 : i32
    return %arg0, %c0_i32 : i32, i32
  }
  func.func @transform_1(%arg0: i32) -> (i32, i32) {
    %c0_i32 = arith.constant 0 : i32
    %c0_i32_0 = arith.constant 0 : i32
    %c0_i32_1 = arith.constant 0 : i32
    return %c0_i32, %c0_i32_0 : i32, i32
  }
  func.func @transform_2(%arg0: i32) -> (i32, i32) {
    %c0_i32 = arith.constant 0 : i32
    %c0_i32_0 = arith.constant 0 : i32
    %c0_i32_1 = arith.constant 0 : i32
    return %c0_i32, %c0_i32_0 : i32, i32
  }
  func.func @transform_3(%arg0: i32) -> (i32, i32) {
    %c0_i32 = arith.constant 0 : i32
    %c0_i32_0 = arith.constant 0 : i32
    return %arg0, %c0_i32 : i32, i32
  }
}

</mosaic_0001>

<bundles_post_ra>
// kernel: tpu_custom_call.1
= control target key start
LH: loop header
LB: loop body
LE: loop exit
PB: predicated region body
PF: predicated region fallthrough
CT: control target
= control target key end

     0   :  { %8 = vsyncpa [#allocation3], 0  ;;  %s324_s0 = inlined_call_operand.hbm [shape: f32[16,16], index: 0, kind: input, shape index: {}]   ;;  %s325_s1 = inlined_call_operand.hbm [shape: f32[16,128], index: 1, kind: input, shape index: {}]   ;;  %s326_s2 = inlined_call_operand.vmem [shape: f32[1,128], index: 2, kind: input, shape index: {}]   ;;  %s327_s3 = inlined_call_operand.hbm [shape: f32[16,128], index: 3, kind: output, shape index: {}]  }
   0x1   :  { %9 = vsyncpa [#allocation6], 0 }
   0x2   :  { %10 = vsyncpa [#allocation4], 0  ;;  %s251_s12 = smov [#allocation2]   ;;  %s179_s16 = scalar_lea.hbm %s324_s0, 256 }
   0x3   :  { %s16_s13 = sshll.u32 %s251_s12, 4  ;;  %p180_p0 = scmp.ne.s32.totalorder %s324_s0, %s179_s16  ;;  %s17_s13 = int_to_ptr.vmem [resolvable:$true] %s16_s13 }
   0x4   :  { %p183_p1 = scmp.lt.u32.totalorder %s179_s16, %s324_s0 }
   0x6   :  { %p185_p2 = pnand %p183_p1, %p180_p0 }
   0x8   :  { %188 = shalt.err (!%p185_p2)
}
   0x9   :  { %s189_s21 = scalar_lea.vmem %s17_s13, 256  ;;  %p194_p4 = scmp.lt.s32.totalorder %s17_s13, %s17_s13 }
   0xa   :  { %p190_p3 = scmp.ne.s32.totalorder %s17_s13, %s189_s21  ;;  %p195_p5 = scmp.lt.s32.totalorder %s189_s21, %s189_s21 }
   0xc   :  { %p196_p6 = por %p195_p5, %p194_p4 }
   0xe   :  { %p197_p7 = pnand %p196_p6, %p190_p3 }
  0x10   :  { %200 = shalt.err (!%p197_p7)
}
  0x11   :  { %s252_s22 = smov 128   ;;  %s253_s23 = smov 8  }
  0x12   :  { %22 = dma.hbm_to_vmem [thread:$0]  %s324_s0, 256, %s17_s13, [#allocation3], %s252_s22, %s252_s22, %s253_s23  }
  0x13   :  { %s254_s26 = smov [#allocation5]   ;;  %s201_s30 = scalar_lea.hbm %s325_s1, 256 }
  0x14   :  { %s28_s27 = sshll.u32 %s254_s26, 4  ;;  %p202_p8 = scmp.ne.s32.totalorder %s325_s1, %s201_s30  ;;  %s29_s27 = int_to_ptr.vmem [resolvable:$true] %s28_s27 }
  0x15   :  { %p205_p9 = scmp.lt.u32.totalorder %s201_s30, %s325_s1 }
  0x17   :  { %p207_p10 = pnand %p205_p9, %p202_p8 }
  0x19   :  { %210 = shalt.err (!%p207_p10)
}
  0x1a   :  { %s211_s8 = scalar_lea.vmem %s29_s27, 256  ;;  %p216_p12 = scmp.lt.s32.totalorder %s29_s27, %s29_s27 }
  0x1b   :  { %p212_p11 = scmp.ne.s32.totalorder %s29_s27, %s211_s8  ;;  %p217_p13 = scmp.lt.s32.totalorder %s211_s8, %s211_s8 }
  0x1d   :  { %p218_p0 = por %p217_p13, %p216_p12 }
  0x1f   :  { %p219_p1 = pnand %p218_p0, %p212_p11 }
  0x21   :  { %222 = shalt.err (!%p219_p1)
}
  0x22   :  { %34 = dma.hbm_to_vmem [thread:$0]  %s325_s1, 256, %s29_s27, [#allocation6], %s252_s22, %s252_s22, %s253_s23  }
  0x23   :  { %245 = dma.done.wait [#allocation3], 256  }
  0x24   :  { %246 = vsyncadd [#allocation3], 4294967040 }
  0x25   :  { %247 = dma.done.wait [#allocation6], 256  }
  0x26   :  { %248 = vsyncadd [#allocation6], 4294967040  ;;  %vm54_vm0 = vcmask 130048   ;;  %v45_v0 = vld [vmem:[#allocation5] sm:$0xff]  ;;  %v46_v1 = vld [vmem:[#allocation5 + $0x8] sm:$0xff]  ;;  %s255_s12 = smov [#allocation7]  }
  0x27   :  { %v43_v2 = vld [vmem:[#allocation2] sm:$0xff]  ;;  %v170_v3 = vpack.c.bf16 %v46_v1, %v45_v0  ;;  %v44_v4 = vld [vmem:[#allocation2 + $0x8] sm:$0xff]  ;;  %s143_s1 = sshll.u32 %s255_s12, 4  ;;  %s144_s1 = int_to_ptr.vmem [resolvable:$true] %s143_s1 }
  0x28   :  { %167 = vmatprep.mubr.msk.f32.mxu0 %vm54_vm0, %v43_v2  ;;  %v156_v5 = vld [vmem:[%s326_s2] ss:$0 sm:$0xff]  ;;  %s223_s13 = scalar_lea.vmem %s144_s1, 256  ;;  %p228_p3 = scmp.lt.s32.totalorder %s144_s1, %s144_s1 }
  0x29   :  { %171 = vmatprep.subr.bf16.mxu0 %v170_v3  ;;  %p224_p2 = scmp.ne.s32.totalorder %s144_s1, %s223_s13  ;;  %p229_p4 = scmp.lt.s32.totalorder %s223_s13, %s223_s13 }
  0x2a   :  { %173 = vmatpush3.bf16.msra.mxu0 %v170_v3 }
  0x2b   :  { %p230_p5 = por %p229_p4, %p228_p3 }
  0x2d   :  { %168 = vmatmul.mubr.msk.f32.vlgmr.msra.gmra.mrb[0].mxu0 %vm54_vm0, %v44_v4  ;;  %p231_p6 = pnand %p230_p5, %p224_p2 }
 0x100   :  { %v169_v6 = vpop.f32.mrb[0].mxu0 }
 0x101   :  { %v133_v7 = vadd.f32 %v169_v6, %v156_v5  ;;  %v127_v8 = vpop.f32.mrb[1].mxu0 }
 0x102   :  { %v128_v9 = vadd.f32 %v156_v5, %v127_v8 }
 0x103   :  { %137 = vst [vmem:[#allocation7 + $0x8] sm:$0xff] %v133_v7 }
 0x104   :  { %136 = vst [vmem:[#allocation7] sm:$0xff] %v128_v9 }
 0x105   :  { %234 = shalt.err (!%p231_p6)
}
 0x106   :  { %s235_s2 = scalar_lea.hbm %s327_s3, 256 }
 0x107   :  { %p236_p7 = scmp.ne.s32.totalorder %s327_s3, %s235_s2  ;;  %p239_p8 = scmp.lt.u32.totalorder %s235_s2, %s327_s3 }
 0x109   :  { %p241_p9 = pnand %p239_p8, %p236_p7 }
 0x10b   :  { %244 = shalt.err (!%p241_p9)
}
 0x10c   :  { %149 = dma.vmem_to_hbm [thread:$0]  %s144_s1, 256, %s327_s3, [#allocation4], %s252_s22, %s252_s22, %s253_s23  }
 0x10d   :  { %249 = dma.done.wait [#allocation4], 256  }
 0x10e   :  { %250 = vsyncadd [#allocation4], 4294967040 }
 0x10f   :  { %153 = vsyncpa [#allocation3], 1 }
 0x110   :  { %154 = vsyncpa [#allocation6], 1 }
 0x111   :  { %155 = vsyncpa [#allocation4], 1 }

</bundles_post_ra>
